<compile_context>
chip_gen: v6e
topology: v6e:2x2x1
jax: 0.10.0
libtpu: 0.0.40
codegen_flags: <defaults>
</compile_context>

<pallas_src>
import functools

import jax
import jax.numpy as jnp
from jax.experimental import pallas as pl
from jax.experimental.pallas import tpu as pltpu

HIDDEN = 128


def _round_up(x, m):
    return ((x + m - 1) // m) * m


def _actor_critic_kernel(x_ref, w1_ref, b1_ref, wh_ref, bh_ref, out_ref):
    # trunk: Linear(input, 128) + ReLU   (bf16 MXU matmul, f32 accumulate)
    x = x_ref[...].astype(jnp.bfloat16)
    h = jnp.dot(x, w1_ref[...], preferred_element_type=jnp.float32)
    h = jnp.maximum(h + b1_ref[...], 0.0)
    # fused heads: [actor logits | critic value | zero padding] in one matmul
    o = jnp.dot(h.astype(jnp.bfloat16), wh_ref[...],
                preferred_element_type=jnp.float32)
    out_ref[...] = (o + bh_ref[...]).astype(out_ref.dtype)


def _batch_tile(B, block_b):
    """Batch tile: multiple of 16 (bf16 sublane packing), capped so that large
    batches keep >= 2 grid steps (v7x megacore sharding of the parallel axis)."""
    b16 = _round_up(max(B, 1), 16)
    half = _round_up(-(-b16 // 2), 16)          # ceil(b16/2) rounded to 16
    return min(block_b, max(16, half), b16)


@functools.partial(jax.jit, static_argnames=("n_actions", "block_b"))
def discrete_actor_critic_forward(x, packed, *, n_actions, block_b=512):
    """x: (B, input_size) f32. packed: dict from pack_params. Returns (logits, value)."""
    B, K = x.shape
    w1, b1, wh, bh = packed["w1"], packed["b1"], packed["wh"], packed["bh"]
    k_in, hidden = w1.shape
    out_w = wh.shape[1]
    assert k_in == K, "x feature dim must match packed w1"

    tm = _batch_tile(B, block_b)
    b_pad = _round_up(B, tm)

    # only the batch dim is ever padded (and only if it doesn't tile evenly)
    x_p = x if b_pad == B else jnp.pad(x, ((0, b_pad - B), (0, 0)))

    grid = (b_pad // tm,)
    flops = 2 * b_pad * (K * hidden + hidden * out_w)
    bytes_accessed = (x_p.size * 4 + w1.size * 2 + wh.size * 2
                      + b1.size * 4 + bh.size * 4 + b_pad * out_w * 2)

    out = pl.pallas_call(
        _actor_critic_kernel,
        out_shape=jax.ShapeDtypeStruct((b_pad, out_w), jnp.bfloat16),
        grid_spec=pltpu.PrefetchScalarGridSpec(
            num_scalar_prefetch=0,
            grid=grid,
            in_specs=[
                pl.BlockSpec((tm, K), lambda i: (i, 0)),          # x tile (f32)
                pl.BlockSpec((K, hidden), lambda i: (0, 0)),      # trunk W (resident)
                pl.BlockSpec((1, hidden), lambda i: (0, 0)),      # trunk b
                pl.BlockSpec((hidden, out_w), lambda i: (0, 0)),  # fused head W
                pl.BlockSpec((1, out_w), lambda i: (0, 0)),       # fused head b
            ],
            out_specs=pl.BlockSpec((tm, out_w), lambda i: (i, 0)),
        ),
        compiler_params=pltpu.CompilerParams(
            dimension_semantics=("parallel",)),
        cost_estimate=pl.CostEstimate(
            flops=flops, transcendentals=0, bytes_accessed=bytes_accessed),
    )(x_p, w1, b1, wh, bh)

    # one lane-contiguous slice of the slab, then split (fuses under jit);
    # cast back to f32 on the tiny (B, A+1) window to keep the module's API.
    head = out[:B, :n_actions + 1].astype(jnp.float32)
    logits = head[:, :n_actions]
    value = head[:, n_actions:n_actions + 1]
    return logits, value


def init_params(key, input_size, n_actions, hidden=HIDDEN):
    """PyTorch nn.Linear-style init: U(-1/sqrt(fan_in), +1/sqrt(fan_in))."""
    def linear(k, fan_in, fan_out):
        kw, kb = jax.random.split(k)
        bound = 1.0 / (fan_in ** 0.5)
        w = jax.random.uniform(kw, (fan_in, fan_out), jnp.float32, -bound, bound)
        b = jax.random.uniform(kb, (fan_out,), jnp.float32, -bound, bound)
        return w, b

    k1, ka, kc = jax.random.split(key, 3)
    w1, b1 = linear(k1, input_size, hidden)
    wa, ba = linear(ka, hidden, n_actions)
    wc, bc = linear(kc, hidden, 1)
    return dict(w1=w1, b1=b1, wa=wa, ba=ba, wc=wc, bc=bc)


def pack_params(p, input_size, n_actions, hidden=HIDDEN):
    """Pack into kernel layout: trunk W unpadded (input_size,128) bf16, heads
    fused + lane-padded to 128 bf16, biases f32 (f32 masters kept outside)."""
    out_w = _round_up(n_actions + 1, 128)

    w1 = p["w1"].astype(jnp.bfloat16)                       # (input_size, 128)
    b1 = p["b1"].reshape(1, hidden).astype(jnp.float32)

    wh = jnp.zeros((hidden, out_w), jnp.float32)
    wh = wh.at[:, :n_actions].set(p["wa"])
    wh = wh.at[:, n_actions:n_actions + 1].set(p["wc"])
    bh = jnp.zeros((1, out_w), jnp.float32)
    bh = bh.at[0, :n_actions].set(p["ba"])
    bh = bh.at[0, n_actions].set(p["bc"][0])

    return dict(w1=w1, b1=b1, wh=wh.astype(jnp.bfloat16), bh=bh)


def reference_forward_f32(x, p):
    """Pure-f32 reference matching the PyTorch module exactly."""
    h = jax.nn.relu(x @ p["w1"] + p["b1"])
    return h @ p["wa"] + p["ba"], h @ p["wc"] + p["bc"]


def reference_forward_mirror(x, packed, n_actions):
    """Mirrors the kernel's bf16-weight / f32-accumulate / bf16-store numerics."""
    xb = x.astype(jnp.bfloat16).astype(jnp.float32)
    w1 = packed["w1"].astype(jnp.float32)
    h = jax.nn.relu(xb @ w1 + packed["b1"])
    hb = h.astype(jnp.bfloat16).astype(jnp.float32)
    o = hb @ packed["wh"].astype(jnp.float32) + packed["bh"]
    o = o.astype(jnp.bfloat16).astype(jnp.float32)
    return o[:, :n_actions], o[:, n_actions:n_actions + 1]


if __name__ == "__main__":
    key = jax.random.PRNGKey(0)
    k_param, k_x1, k_x2 = jax.random.split(key, 3)

    input_size = 32
    n_actions = 6

    params = init_params(k_param, input_size, n_actions)
    packed = pack_params(params, input_size, n_actions)

    # --- small batch (single tile, single grid point) ---
    x_small = jax.random.normal(k_x1, (4, input_size), jnp.float32)
    logits, value = discrete_actor_critic_forward(x_small, packed,
                                                  n_actions=n_actions)
    jax.block_until_ready((logits, value))
    assert logits.shape == (4, n_actions)
    assert value.shape == (4, 1)

    ref_l, ref_v = reference_forward_mirror(x_small, packed, n_actions)
    assert jnp.allclose(logits, ref_l, atol=2e-2, rtol=2e-2)
    assert jnp.allclose(value, ref_v, atol=2e-2, rtol=2e-2)
    f32_l, f32_v = reference_forward_f32(x_small, params)
    assert jnp.allclose(logits, f32_l, atol=6e-2, rtol=6e-2)
    assert jnp.allclose(value, f32_v, atol=6e-2, rtol=6e-2)

    # --- larger batch: exercises batch tiling + >=2-step "parallel" grid axis ---
    x_big = jax.random.normal(k_x2, (256, input_size), jnp.float32)
    logits_b, value_b = discrete_actor_critic_forward(x_big, packed,
                                                      n_actions=n_actions)
    jax.block_until_ready((logits_b, value_b))
    assert logits_b.shape == (256, n_actions)
    assert value_b.shape == (256, 1)
    ref_lb, ref_vb = reference_forward_mirror(x_big, packed, n_actions)
    assert jnp.allclose(logits_b, ref_lb, atol=2e-2, rtol=2e-2)
    assert jnp.allclose(value_b, ref_vb, atol=2e-2, rtol=2e-2)

    print("KERNEL_OK")
</pallas_src>

<mosaic_0001>
module attributes {stable_mosaic.version = 11 : i64} {
  func.func @_actor_critic_kernel(%arg0: i32, %arg1: memref<16x32xf32, #tpu.memory_space<vmem>>, %arg2: memref<32x128xbf16, #tpu.memory_space<vmem>>, %arg3: memref<1x128xf32, #tpu.memory_space<vmem>>, %arg4: memref<128x128xbf16, #tpu.memory_space<vmem>>, %arg5: memref<1x128xf32, #tpu.memory_space<vmem>>, %arg6: memref<16x128xbf16, #tpu.memory_space<vmem>>) attributes {dimension_semantics = [#tpu.dimension_semantics<parallel>], iteration_bounds = array<i64: 1>, scalar_prefetch = 0 : i64, scratch_operands = 0 : i64, tpu.core_type = #tpu.core_type<tc>, window_params = [{transform_indices = @transform_0, window_bounds = array<i64: 16, 32>}, {pipeline_mode = #tpu.pipeline_mode<synchronous>, transform_indices = @transform_1, window_bounds = array<i64: 32, 128>}, {pipeline_mode = #tpu.pipeline_mode<synchronous>, transform_indices = @transform_2, window_bounds = array<i64: 1, 128>}, {pipeline_mode = #tpu.pipeline_mode<synchronous>, transform_indices = @transform_3, window_bounds = array<i64: 128, 128>}, {pipeline_mode = #tpu.pipeline_mode<synchronous>, transform_indices = @transform_4, window_bounds = array<i64: 1, 128>}, {transform_indices = @transform_5, window_bounds = array<i64: 16, 128>}]} {
    %c0 = arith.constant 0 : index
    %c0_0 = arith.constant 0 : index
    %0 = vector.load %arg1[%c0, %c0_0] : memref<16x32xf32, #tpu.memory_space<vmem>>, vector<16x32xf32>
    %1 = arith.truncf %0 : vector<16x32xf32> to vector<16x32xbf16>
    %c0_1 = arith.constant 0 : index
    %c0_2 = arith.constant 0 : index
    %2 = vector.load %arg2[%c0_1, %c0_2] : memref<32x128xbf16, #tpu.memory_space<vmem>>, vector<32x128xbf16>
    %cst = arith.constant dense<0.000000e+00> : vector<16x128xf32>
    %3 = tpu.matmul %1, %2, %cst {dimension_numbers = #tpu.dot_dimension_numbers<[1], [0], [0], [1], [0, 0, 1, 1], [], []>} : vector<16x32xbf16>, vector<32x128xbf16>, vector<16x128xf32> -> vector<16x128xf32>
    %c0_3 = arith.constant 0 : index
    %c0_4 = arith.constant 0 : index
    %4 = vector.load %arg3[%c0_3, %c0_4] : memref<1x128xf32, #tpu.memory_space<vmem>>, vector<1x128xf32>
    %5 = vector.broadcast %4 : vector<1x128xf32> to vector<16x128xf32>
    %6 = arith.addf %3, %5 : vector<16x128xf32>
    %cst_5 = arith.constant 0.000000e+00 : f32
    %7 = vector.broadcast %cst_5 : f32 to vector<16x128xf32>
    %8 = arith.maximumf %6, %7 : vector<16x128xf32>
    %9 = arith.truncf %8 : vector<16x128xf32> to vector<16x128xbf16>
    %c0_6 = arith.constant 0 : index
    %c0_7 = arith.constant 0 : index
    %10 = vector.load %arg4[%c0_6, %c0_7] : memref<128x128xbf16, #tpu.memory_space<vmem>>, vector<128x128xbf16>
    %cst_8 = arith.constant dense<0.000000e+00> : vector<16x128xf32>
    %11 = tpu.matmul %9, %10, %cst_8 {dimension_numbers = #tpu.dot_dimension_numbers<[1], [0], [0], [1], [0, 0, 1, 1], [], []>} : vector<16x128xbf16>, vector<128x128xbf16>, vector<16x128xf32> -> vector<16x128xf32>
    %c0_9 = arith.constant 0 : index
    %c0_10 = arith.constant 0 : index
    %12 = vector.load %arg5[%c0_9, %c0_10] : memref<1x128xf32, #tpu.memory_space<vmem>>, vector<1x128xf32>
    %13 = vector.broadcast %12 : vector<1x128xf32> to vector<16x128xf32>
    %14 = arith.addf %11, %13 : vector<16x128xf32>
    %15 = arith.truncf %14 : vector<16x128xf32> to vector<16x128xbf16>
    %c0_11 = arith.constant 0 : index
    %c0_12 = arith.constant 0 : index
    %16 = vector.load %arg6[%c0_11, %c0_12] : memref<16x128xbf16, #tpu.memory_space<vmem>>, vector<16x128xbf16>
    tpu.vector_store %arg6[%c0_11, %c0_12], %15 {strides = array<i32>} : memref<16x128xbf16, #tpu.memory_space<vmem>>, vector<16x128xbf16>,
    return
  }
  func.func @transform_0(%arg0: i32) -> (i32, i32) {
    %c0_i32 = arith.constant 0 : i32
    %c0_i32_0 = arith.constant 0 : i32
    return %arg0, %c0_i32 : i32, i32
  }
  func.func @transform_1(%arg0: i32) -> (i32, i32) {
    %c0_i32 = arith.constant 0 : i32
    %c0_i32_0 = arith.constant 0 : i32
    %c0_i32_1 = arith.constant 0 : i32
    return %c0_i32, %c0_i32_0 : i32, i32
  }
  func.func @transform_2(%arg0: i32) -> (i32, i32) {
    %c0_i32 = arith.constant 0 : i32
    %c0_i32_0 = arith.constant 0 : i32
    %c0_i32_1 = arith.constant 0 : i32
    return %c0_i32, %c0_i32_0 : i32, i32
  }
  func.func @transform_3(%arg0: i32) -> (i32, i32) {
    %c0_i32 = arith.constant 0 : i32
    %c0_i32_0 = arith.constant 0 : i32
    %c0_i32_1 = arith.constant 0 : i32
    return %c0_i32, %c0_i32_0 : i32, i32
  }
  func.func @transform_4(%arg0: i32) -> (i32, i32) {
    %c0_i32 = arith.constant 0 : i32
    %c0_i32_0 = arith.constant 0 : i32
    %c0_i32_1 = arith.constant 0 : i32
    return %c0_i32, %c0_i32_0 : i32, i32
  }
  func.func @transform_5(%arg0: i32) -> (i32, i32) {
    %c0_i32 = arith.constant 0 : i32
    %c0_i32_0 = arith.constant 0 : i32
    return %arg0, %c0_i32 : i32, i32
  }
}

</mosaic_0001>

<bundles_post_ra>
// kernel: discrete_actor_critic_forward.1
= control target key start
LH: loop header
LB: loop body
LE: loop exit
PB: predicated region body
PF: predicated region fallthrough
CT: control target
= control target key end

     0   :  { %10 = vsyncpa [#allocation3], 0  ;;  %s335_s18 = smov [#allocation2]   ;;  %s394_s0 = inlined_call_operand.vmem [shape: f32[16,32], index: 0, kind: input, shape index: {}]   ;;  %s395_s1 = inlined_call_operand.vmem [shape: bf16[32,128], index: 1, kind: input, shape index: {}]   ;;  %s396_s2 = inlined_call_operand.vmem [shape: f32[1,128], index: 2, kind: input, shape index: {}]   ;;  %s397_s3 = inlined_call_operand.hbm [shape: bf16[128,128], index: 3, kind: input, shape index: {}]   ;;  %s398_s4 = inlined_call_operand.vmem [shape: f32[1,128], index: 4, kind: input, shape index: {}]   ;;  %s399_s5 = inlined_call_operand.vmem [shape: bf16[16,128], index: 5, kind: output, shape index: {}]  }
   0x1   :  { %s22_s19 = sshll.u32 %s335_s18, 4  ;;  %s23_s19 = int_to_ptr.vmem [resolvable:$true] %s22_s19 }
   0x2   :  { %s321_s20 = scalar_lea.vmem %s23_s19, 1024  ;;  %p326_p1 = scmp.lt.s32.totalorder %s23_s19, %s23_s19 }
   0x3   :  { %p322_p0 = scmp.ne.s32.totalorder %s23_s19, %s321_s20  ;;  %p327_p2 = scmp.lt.s32.totalorder %s321_s20, %s321_s20 }
   0x5   :  { %p328_p3 = por %p327_p2, %p326_p1 }
   0x7   :  { %p329_p4 = pnand %p328_p3, %p322_p0 }
   0x9   :  { %332 = shalt.err (!%p329_p4)
}
   0xa   :  { %s336_s21 = smov 64   ;;  %s337_s22 = smov 4  }
   0xb   :  { %28 = dma.hbm_to_vmem [thread:$0]  %s397_s3, 1024, %s23_s19, [#allocation3], %s336_s21, %s336_s21, %s337_s22  }
   0xc   :  { %333 = dma.done.wait [#allocation3], 1024  }
   0xd   :  { %334 = vsyncadd [#allocation3], 4294966272  ;;  %v338_v0 = vmov 0.0   ;;  %vm339_vm0 = vmmov 0   ;;  %v303_v1 = vld [vmem:[%s395_s1 + $0x8] sm:$0xff]   ;;  %v304_v2 = vld [vmem:[%s395_s1] sm:$0xff]  }
   0xe   :  { %270 = vmatprep.subr.bf16.mxu0 %v338_v0  ;;  %274 = vmatprep.mubr.msk.bf16.mxu0 %vm339_vm0, %v338_v0  ;;  %v35_v3 = vld [vmem:[%s394_s0] sm:$0xff]  ;;  %v36_v4 = vld [vmem:[%s394_s0 + $0x8] sm:$0xff]  ;;  %v305_v5 = vld [vmem:[#allocation2 + $0x38] sm:$0xff]   ;;  %vm61_vm1 = vcmask 261120  }
   0xf   :  { %278 = vmatprep.subr.bf16.mxu1 %v338_v0  ;;  %294 = vmatprep.mubr.msk.bf16.mxu1 %vm339_vm0, %v338_v0  ;;  %v37_v6 = vpack.c.bf16 %v36_v4, %v35_v3  ;;  %v306_v7 = vld [vmem:[#allocation2 + $0x30] sm:$0xff]   ;;  %v307_v8 = vld [vmem:[#allocation2 + $0x28] sm:$0xff]   ;;  %v308_v9 = vld [vmem:[#allocation2 + $0x20] sm:$0xff]  }
  0x10   :  { %271 = vmatpush3.bf16.msra.mxu0 %v303_v1  ;;  %279 = vmatpush3.bf16.msra.mxu1 %v305_v5  ;;  %v309_v10 = vld [vmem:[#allocation2 + $0x18] sm:$0xff]   ;;  %v310_v11 = vld [vmem:[#allocation2 + $0x10] sm:$0xff]   ;;  %v311_v12 = vld [vmem:[#allocation2 + $0x8] sm:$0xff]  }
  0x11   :  { %272 = vmatprep.subr.bf16.mxu0 %v338_v0  ;;  %280 = vmatprep.subr.bf16.mxu1 %v338_v0  ;;  %v312_v13 = vld [vmem:[#allocation2] sm:$0xff]  }
  0x12   :  { %v236_v14 = vld [vmem:[%s396_s2] ss:$0 sm:$0xff] }
  0x13   :  { %v240_v25 = vld [vmem:[%s398_s4] ss:$0 sm:$0xff] }
  0x14   :  { %273 = vmatpush3.bf16.msra.mxu0 %v304_v2  ;;  %281 = vmatpush3.bf16.msra.mxu1 %v306_v7 }
  0x15   :  { %282 = vmatprep.subr.bf16.mxu1 %v338_v0 }
  0x17   :  { %275 = vmatmul.mubr.msk.bf16.vlgmr.msra.gmra.mxu0 %vm61_vm1, %v37_v6 }
  0x18   :  { %283 = vmatpush3.bf16.msra.mxu1 %v307_v8 }
  0x19   :  { %284 = vmatprep.subr.bf16.mxu1 %v338_v0 }
  0x1c   :  { %285 = vmatpush3.bf16.msra.mxu1 %v308_v9 }
  0x1d   :  { %286 = vmatprep.subr.bf16.mxu1 %v338_v0 }
  0x20   :  { %287 = vmatpush3.bf16.msra.mxu1 %v309_v10 }
  0x21   :  { %288 = vmatprep.subr.bf16.mxu1 %v338_v0 }
  0x24   :  { %289 = vmatpush3.bf16.msra.mxu1 %v310_v11 }
  0x25   :  { %290 = vmatprep.subr.bf16.mxu1 %v338_v0 }
  0x28   :  { %291 = vmatpush3.bf16.msra.mxu1 %v311_v12 }
  0x29   :  { %292 = vmatprep.subr.bf16.mxu1 %v338_v0 }
  0x2c   :  { %293 = vmatpush3.bf16.msra.mxu1 %v312_v13 }
  0xd7   :  { %v99_v15 = vpop.f32.mrf.mxu0 }
  0xd8   :  { %v100_v17 = vadd.f32 %v236_v14, %v99_v15 }
  0xd9   :  { %v276_v16 = vpop.f32.mrf.mxu0 }
  0xda   :  { %v106_v21 = vmax.f32 %v100_v17, 0.0 }
  0xdb   :  { %v102_v18 = vpop.f32.mrf.mxu0 }
  0xdc   :  { %v103_v19 = vadd.f32 %v236_v14, %v102_v18 }
  0xdd   :  { %v277_v20 = vpop.f32.mrf.mxu0 }
  0xde   :  { %v107_v22 = vmax.f32 %v103_v19, 0.0 }
  0xe0   :  { %v108_v23 = vpack.c.bf16 %v107_v22, %v106_v21 }
  0xe2   :  { %295 = vmatmul.mubr.bf16.vlgmr.msra.gmra.mxu1 %v108_v23 }
 0x1a2   :  { %v214_v24 = vpop.f32.mrf.mxu1 }
 0x1a3   :  { %v215_v28 = vadd.f32 %v240_v25, %v214_v24 }
 0x1a4   :  { %v296_v26 = vpop.f32.mrf.mxu1 }
 0x1a6   :  { %v217_v27 = vpop.f32.mrf.mxu1 }
 0x1a7   :  { %v218_v29 = vadd.f32 %v240_v25, %v217_v27 }
 0x1a8   :  { %v297_v30 = vpop.f32.mrf.mxu1 }
 0x1a9   :  { %v256_v31 = vpack.c.bf16 %v218_v29, %v215_v28 }
 0x1ab   :  { %257 = vst [vmem:[%s399_s5] sm:$0xff] %v256_v31  }
 0x1ac   :  { %235 = vsyncpa [#allocation3], 1 }

</bundles_post_ra>
